<compile_context>
chip_gen: v5e
topology: v5e:2x2
jax: 0.10.0
libtpu: 0.0.40
codegen_flags: <defaults>
</compile_context>

<pallas_src>
import math
import functools

import jax
import jax.numpy as jnp
from jax.experimental import pallas as pl
from jax.experimental.pallas import tpu as pltpu


def _round_up(x, m):
    return (x + m - 1) // m * m


# --------------------------------------------------------------------------
# Fused MLP kernel
# --------------------------------------------------------------------------
def _fused_mlp_kernel(x_ref, *refs, activations, compute_dtype):
    """Fused MLP on one row tile.

    x_ref   : (TM, in_dim)                input row tile
    refs    : w0, b0, w1, b1, ..., out_ref
              w_l : (in_l, out_l)          full weight, resident in VMEM
              b_l : (1, out_l)             full bias row
    out_ref : (TM, output_dim)
    """
    out_ref = refs[-1]
    wb = refs[:-1]
    num_layers = len(activations)

    h = x_ref[...].astype(compute_dtype)
    acc = None
    for li, act in enumerate(activations):
        w = wb[2 * li][...]
        b = wb[2 * li + 1][...]
        acc = jnp.dot(h, w, preferred_element_type=jnp.float32)
        acc = acc + b.astype(jnp.float32)
        if act == "relu":
            acc = jnp.maximum(acc, 0.0)
        elif act == "sigmoid":
            acc = jax.nn.sigmoid(acc)  # EUP path
        if li < num_layers - 1:
            h = acc.astype(compute_dtype)
    out_ref[...] = acc.astype(out_ref.dtype)


# --------------------------------------------------------------------------
# Parameter init / preparation
# --------------------------------------------------------------------------
def init_mlp_params(key, input_dim, hidden_dim, output_dim, num_layers):
    """Deterministic init matching nn.Linear defaults.

    Weights are stored ALREADY TRANSPOSED as (in_features, out_features) so
    the forward pass never emits an XLA transpose.
    """
    h = [hidden_dim] * (num_layers - 1)
    dims = list(zip([input_dim] + h, h + [output_dim]))
    params = []
    for (n_in, n_out) in dims:
        key, kw, kb = jax.random.split(key, 3)
        bound_w = 1.0 / math.sqrt(n_in) * math.sqrt(3.0)  # kaiming_uniform a=sqrt(5)
        w_t = jax.random.uniform(kw, (n_in, n_out), jnp.float32, -bound_w, bound_w)
        bound_b = 1.0 / math.sqrt(n_in)
        b = jax.random.uniform(kb, (n_out,), jnp.float32, -bound_b, bound_b)
        params.append((w_t, b))
    return params


def prepare_fused_params(params, compute_dtype=jnp.float32):
    """Cast weights to the compute dtype and reshape biases to (1, out).

    No lane padding: layer widths here (32/64/16) are already legal block
    shapes because whole-array blocks are used for weights/biases.
    """
    prepared = []
    for w_t, b in params:
        prepared.append((w_t.astype(compute_dtype),
                         b.reshape(1, -1).astype(jnp.float32)))
    return prepared


def _choose_tile_m(n_rows, max_tile_m):
    # Big tiles to amortize ~0.35us/step overhead, but aim for >=2 row tiles
    # so the "parallel" row axis can split across v7x's two TensorCores.
    half = _round_up(pl.cdiv(n_rows, 2), 8)
    return max(8, min(_round_up(max_tile_m, 8), half))


# --------------------------------------------------------------------------
# Forward pass
# --------------------------------------------------------------------------
def mlp_fused_forward(x, fused_params, output_dim, sigmoid_output=False,
                      max_tile_m=2048, compute_dtype=jnp.float32):
    """x: (..., input_dim). One fused pallas_call for the whole MLP.

    For bf16 I/O on v6e/v7x, pass x already in bf16 and compute_dtype=bf16;
    accumulation stays f32 inside the kernel.
    """
    lead_shape = x.shape[:-1]
    in_dim = x.shape[-1]
    x2d = x.reshape(-1, in_dim)
    n_rows = x2d.shape[0]

    tile_m = _choose_tile_m(n_rows, max_tile_m)
    grid_m = pl.cdiv(n_rows, tile_m)

    num_layers = len(fused_params)
    activations = tuple(
        "relu" if i < num_layers - 1 else ("sigmoid" if sigmoid_output else "none")
        for i in range(num_layers)
    )

    # Input rows tiled; weights/biases passed as full (resident) blocks.
    in_specs = [pl.BlockSpec((tile_m, in_dim), lambda i: (i, 0))]
    flat_args = [x2d]
    flops = 0
    param_bytes = 0
    for w, b2 in fused_params:
        kin_l, kout_l = w.shape
        in_specs.append(pl.BlockSpec((kin_l, kout_l), lambda i: (0, 0)))
        in_specs.append(pl.BlockSpec((1, kout_l), lambda i: (0, 0)))
        flat_args.append(w)
        flat_args.append(b2)
        flops += 2 * n_rows * kin_l * kout_l
        param_bytes += w.size * w.dtype.itemsize + b2.size * b2.dtype.itemsize

    kernel = functools.partial(
        _fused_mlp_kernel, activations=activations, compute_dtype=compute_dtype
    )

    bytes_accessed = (x2d.size * x2d.dtype.itemsize
                      + n_rows * output_dim * jnp.dtype(x.dtype).itemsize
                      + param_bytes)
    transcendentals = n_rows * output_dim if sigmoid_output else 0

    out2d = pl.pallas_call(
        kernel,
        out_shape=jax.ShapeDtypeStruct((n_rows, output_dim), x.dtype),
        grid=(grid_m,),
        in_specs=in_specs,
        out_specs=pl.BlockSpec((tile_m, output_dim), lambda i: (i, 0)),
        compiler_params=pltpu.CompilerParams(
            dimension_semantics=("parallel",),   # row tiles shard across TCs
        ),
        cost_estimate=pl.CostEstimate(
            flops=flops,
            transcendentals=transcendentals,
            bytes_accessed=bytes_accessed,
        ),
    )(*flat_args)

    return out2d.reshape(*lead_shape, output_dim)


# --------------------------------------------------------------------------
# Pure-JAX reference
# --------------------------------------------------------------------------
def mlp_reference(x, params, sigmoid_output=False):
    num_layers = len(params)
    for i, (w_t, b) in enumerate(params):
        x = x @ w_t + b
        if i < num_layers - 1:
            x = jnp.maximum(x, 0.0)
    if sigmoid_output:
        x = jax.nn.sigmoid(x)
    return x


if __name__ == "__main__":
    key = jax.random.PRNGKey(0)
    kx, kp = jax.random.split(key)

    # MLP(input_dim=32, hidden_dim=64, output_dim=16, num_layers=3)
    input_dim, hidden_dim, output_dim, num_layers = 32, 64, 16, 3
    sigmoid_output = False

    # x: (batch=2, seq=8, input_dim=32)
    x = jax.random.normal(kx, (2, 8, input_dim), dtype=jnp.float32)
    params = init_mlp_params(kp, input_dim, hidden_dim, output_dim, num_layers)

    # Cast / reshape once (not per forward call).
    fused_params = prepare_fused_params(params, compute_dtype=jnp.float32)

    out = mlp_fused_forward(
        x, fused_params, output_dim,
        sigmoid_output=sigmoid_output, max_tile_m=2048, compute_dtype=jnp.float32,
    )
    out = jax.block_until_ready(out)

    ref = mlp_reference(x, params, sigmoid_output=sigmoid_output)
    assert out.shape == (2, 8, output_dim), out.shape
    assert jnp.allclose(out, ref, atol=1e-5, rtol=1e-5), "mismatch vs reference"

    print("KERNEL_OK")
</pallas_src>

<mosaic_0001>
module attributes {stable_mosaic.version = 11 : i64} {
  func.func @_fused_mlp_kernel(%arg0: i32, %arg1: memref<8x32xf32, #tpu.memory_space<vmem>>, %arg2: memref<32x64xf32, #tpu.memory_space<vmem>>, %arg3: memref<1x64xf32, #tpu.memory_space<vmem>>, %arg4: memref<64x64xf32, #tpu.memory_space<vmem>>, %arg5: memref<1x64xf32, #tpu.memory_space<vmem>>, %arg6: memref<64x16xf32, #tpu.memory_space<vmem>>, %arg7: memref<1x16xf32, #tpu.memory_space<vmem>>, %arg8: memref<8x16xf32, #tpu.memory_space<vmem>>) attributes {dimension_semantics = [#tpu.dimension_semantics<parallel>], iteration_bounds = array<i64: 2>, scalar_prefetch = 0 : i64, scratch_operands = 0 : i64, tpu.core_type = #tpu.core_type<tc>, window_params = [{transform_indices = @transform_0, window_bounds = array<i64: 8, 32>}, {pipeline_mode = #tpu.pipeline_mode<synchronous>, transform_indices = @transform_1, window_bounds = array<i64: 32, 64>}, {pipeline_mode = #tpu.pipeline_mode<synchronous>, transform_indices = @transform_2, window_bounds = array<i64: 1, 64>}, {pipeline_mode = #tpu.pipeline_mode<synchronous>, transform_indices = @transform_3, window_bounds = array<i64: 64, 64>}, {pipeline_mode = #tpu.pipeline_mode<synchronous>, transform_indices = @transform_4, window_bounds = array<i64: 1, 64>}, {pipeline_mode = #tpu.pipeline_mode<synchronous>, transform_indices = @transform_5, window_bounds = array<i64: 64, 16>}, {pipeline_mode = #tpu.pipeline_mode<synchronous>, transform_indices = @transform_6, window_bounds = array<i64: 1, 16>}, {transform_indices = @transform_7, window_bounds = array<i64: 8, 16>}]} {
    %c0 = arith.constant 0 : index
    %c0_0 = arith.constant 0 : index
    %0 = vector.load %arg1[%c0, %c0_0] : memref<8x32xf32, #tpu.memory_space<vmem>>, vector<8x32xf32>
    %c0_1 = arith.constant 0 : index
    %c0_2 = arith.constant 0 : index
    %1 = vector.load %arg2[%c0_1, %c0_2] : memref<32x64xf32, #tpu.memory_space<vmem>>, vector<32x64xf32>
    %c0_3 = arith.constant 0 : index
    %c0_4 = arith.constant 0 : index
    %2 = vector.load %arg3[%c0_3, %c0_4] : memref<1x64xf32, #tpu.memory_space<vmem>>, vector<1x64xf32>
    %cst = arith.constant dense<0.000000e+00> : vector<8x64xf32>
    %3 = tpu.matmul %0, %1, %cst {dimension_numbers = #tpu.dot_dimension_numbers<[1], [0], [0], [1], [0, 0, 1, 1], [], []>} : vector<8x32xf32>, vector<32x64xf32>, vector<8x64xf32> -> vector<8x64xf32>
    %4 = vector.broadcast %2 : vector<1x64xf32> to vector<8x64xf32>
    %5 = arith.addf %3, %4 : vector<8x64xf32>
    %cst_5 = arith.constant 0.000000e+00 : f32
    %6 = vector.broadcast %cst_5 : f32 to vector<8x64xf32>
    %7 = arith.maximumf %5, %6 : vector<8x64xf32>
    %c0_6 = arith.constant 0 : index
    %c0_7 = arith.constant 0 : index
    %8 = vector.load %arg4[%c0_6, %c0_7] : memref<64x64xf32, #tpu.memory_space<vmem>>, vector<64x64xf32>
    %c0_8 = arith.constant 0 : index
    %c0_9 = arith.constant 0 : index
    %9 = vector.load %arg5[%c0_8, %c0_9] : memref<1x64xf32, #tpu.memory_space<vmem>>, vector<1x64xf32>
    %cst_10 = arith.constant dense<0.000000e+00> : vector<8x64xf32>
    %10 = tpu.matmul %7, %8, %cst_10 {dimension_numbers = #tpu.dot_dimension_numbers<[1], [0], [0], [1], [0, 0, 1, 1], [], []>} : vector<8x64xf32>, vector<64x64xf32>, vector<8x64xf32> -> vector<8x64xf32>
    %11 = vector.broadcast %9 : vector<1x64xf32> to vector<8x64xf32>
    %12 = arith.addf %10, %11 : vector<8x64xf32>
    %cst_11 = arith.constant 0.000000e+00 : f32
    %13 = vector.broadcast %cst_11 : f32 to vector<8x64xf32>
    %14 = arith.maximumf %12, %13 : vector<8x64xf32>
    %c0_12 = arith.constant 0 : index
    %c0_13 = arith.constant 0 : index
    %15 = vector.load %arg6[%c0_12, %c0_13] : memref<64x16xf32, #tpu.memory_space<vmem>>, vector<64x16xf32>
    %c0_14 = arith.constant 0 : index
    %c0_15 = arith.constant 0 : index
    %16 = vector.load %arg7[%c0_14, %c0_15] : memref<1x16xf32, #tpu.memory_space<vmem>>, vector<1x16xf32>
    %cst_16 = arith.constant dense<0.000000e+00> : vector<8x16xf32>
    %17 = tpu.matmul %14, %15, %cst_16 {dimension_numbers = #tpu.dot_dimension_numbers<[1], [0], [0], [1], [0, 0, 1, 1], [], []>} : vector<8x64xf32>, vector<64x16xf32>, vector<8x16xf32> -> vector<8x16xf32>
    %18 = vector.broadcast %16 : vector<1x16xf32> to vector<8x16xf32>
    %19 = arith.addf %17, %18 : vector<8x16xf32>
    %c0_17 = arith.constant 0 : index
    %c0_18 = arith.constant 0 : index
    %20 = vector.load %arg8[%c0_17, %c0_18] : memref<8x16xf32, #tpu.memory_space<vmem>>, vector<8x16xf32>
    tpu.vector_store %arg8[%c0_17, %c0_18], %19 {strides = array<i32>} : memref<8x16xf32, #tpu.memory_space<vmem>>, vector<8x16xf32>,
    return
  }
  func.func @transform_0(%arg0: i32) -> (i32, i32) {
    %c0_i32 = arith.constant 0 : i32
    %c0_i32_0 = arith.constant 0 : i32
    return %arg0, %c0_i32 : i32, i32
  }
  func.func @transform_1(%arg0: i32) -> (i32, i32) {
    %c0_i32 = arith.constant 0 : i32
    %c0_i32_0 = arith.constant 0 : i32
    %c0_i32_1 = arith.constant 0 : i32
    return %c0_i32, %c0_i32_0 : i32, i32
  }
  func.func @transform_2(%arg0: i32) -> (i32, i32) {
    %c0_i32 = arith.constant 0 : i32
    %c0_i32_0 = arith.constant 0 : i32
    %c0_i32_1 = arith.constant 0 : i32
    return %c0_i32, %c0_i32_0 : i32, i32
  }
  func.func @transform_3(%arg0: i32) -> (i32, i32) {
    %c0_i32 = arith.constant 0 : i32
    %c0_i32_0 = arith.constant 0 : i32
    %c0_i32_1 = arith.constant 0 : i32
    return %c0_i32, %c0_i32_0 : i32, i32
  }
  func.func @transform_4(%arg0: i32) -> (i32, i32) {
    %c0_i32 = arith.constant 0 : i32
    %c0_i32_0 = arith.constant 0 : i32
    %c0_i32_1 = arith.constant 0 : i32
    return %c0_i32, %c0_i32_0 : i32, i32
  }
  func.func @transform_5(%arg0: i32) -> (i32, i32) {
    %c0_i32 = arith.constant 0 : i32
    %c0_i32_0 = arith.constant 0 : i32
    %c0_i32_1 = arith.constant 0 : i32
    return %c0_i32, %c0_i32_0 : i32, i32
  }
  func.func @transform_6(%arg0: i32) -> (i32, i32) {
    %c0_i32 = arith.constant 0 : i32
    %c0_i32_0 = arith.constant 0 : i32
    %c0_i32_1 = arith.constant 0 : i32
    return %c0_i32, %c0_i32_0 : i32, i32
  }
  func.func @transform_7(%arg0: i32) -> (i32, i32) {
    %c0_i32 = arith.constant 0 : i32
    %c0_i32_0 = arith.constant 0 : i32
    return %arg0, %c0_i32 : i32, i32
  }
}

</mosaic_0001>

<bundles_post_ra>
// kernel: tpu_custom_call.1
= control target key start
LH: loop header
LB: loop body
LE: loop exit
PB: predicated region body
PF: predicated region fallthrough
CT: control target
= control target key end

     0   :  { %12 = vsyncpa [#allocation3], 0  ;;  %s849_s0 = inlined_call_operand.vmem [shape: f32[16,32], index: 0, kind: input, shape index: {}]   ;;  %s850_s1 = inlined_call_operand.hbm [shape: f32[32,64], index: 1, kind: input, shape index: {}]   ;;  %s851_s2 = inlined_call_operand.vmem [shape: f32[1,64], index: 2, kind: input, shape index: {}]   ;;  %s852_s3 = inlined_call_operand.vmem [shape: f32[64,64], index: 3, kind: input, shape index: {}]   ;;  %s853_s4 = inlined_call_operand.vmem [shape: f32[1,64], index: 4, kind: input, shape index: {}]   ;;  %s854_s5 = inlined_call_operand.vmem [shape: f32[64,16], index: 5, kind: input, shape index: {}]   ;;  %s855_s6 = inlined_call_operand.vmem [shape: f32[1,16], index: 6, kind: input, shape index: {}]   ;;  %s856_s7 = inlined_call_operand.hbm [shape: f32[16,16], index: 7, kind: output, shape index: {}]  }
   0x1   :  { %13 = vsyncpa [#allocation4], 0 }
   0x2   :  { %15 = vsyncpa [#allocation4 + $0x1], 0  ;;  %s697_s24 = smov 0   ;;  %s699_s25 = smov 0  }
   0x3   :  { %s701_s26 = smov 0   ;;  %s703_s27 = smov 0  }
   0x4 LB: > { %s718_s28 = sadd.s32 4294967295, %s652_s27   ;;  %s486_s29 = sadd.s32 4294967294, %s652_s27   ;;  %s652_s27 = sphi %s703_s27, %s862_s27   ;;  %s648_s26 = sphi %s701_s26, %s861_s26   ;;  %s644_s25 = sphi %s699_s25, %s860_s25   ;;  %s640_s24 = sphi %s697_s24, %s859_s24  }
   0x5   : > { %s722_s30 = sadd.s32 1, %s652_s27   ;;  %s180_s8 = sadd.s32 1, %s648_s26 }
   0x6   : > { %s177_s9 = ssub.s32 %s652_s27, %s722_s30  ;;  %p190_p0 = scmp.ne.s32.totalorder %s648_s26, %s644_s25 }
   0x7   : > { %p178_p1 = scmp.eq.s32.totalorder %s177_s9, 0  ;;  %p191_p2 = scmp.eq.s32.totalorder %s718_s28, 1 }
   0x8   : > { %p196_p3 = scmp.ne.s32.totalorder %s644_s25, %s640_s24  ;;  %p197_p4 = scmp.eq.s32.totalorder %s486_s29, 1 }
   0x9   : > { %s733_s10 = scalar_select %p178_p1, %s648_s26, %s180_s8  }
   0xa   : > { %p735_p5 = por %p191_p2, %p190_p0  ;;  %p739_p6 = por %p197_p4, %p196_p3 }
   0xb   : > { %p487_p7 = scmp.ge.s32.totalorder %s652_s27, 1  ;;  %p204_p8 = scmp.lt.s32.totalorder %s652_s27, 3 }
   0xc   : > { %p515_p9 = scmp.eq.s32.totalorder %s718_s28, 0  ;;  %s215_s15 = sshll.u32 %s850_s1, 4  ;;  %s216_s15 = int_to_ptr.hbm [resolvable:$true] %s215_s15 }
   0xd   : > { %p205_p10 = pnand %p487_p7, %p204_p8  ;;  %s654_s16 = smov [#allocation2]  }
   0xe   : > { %s217_s17 = sshll.u32 %s654_s16, 4  ;;  %s655_s18 = smov 128   ;;  %s218_s17 = int_to_ptr.vmem [resolvable:$true] %s217_s17 }
   0xf   : > { %p507_p11 = pneg %p205_p10  ;;  %s656_s19 = smov 8  }
  0x10   : > { %255 = sbr.rel (%p205_p10) target bundleno = 427 (0x1ab), region = 48 }
  0x11   : > { %p508_p12 = pnand %p515_p9, %p507_p11 }
  0x13   : > { %510 = dma.hbm_to_vmem [thread:$0]  (!%p508_p12), %s216_s15, 512, %s218_s17, [#allocation3], %s655_s18, %s655_s18, %s656_s19  }
  0x15   : > { %631 = dma.done.wait (%p515_p9), [#allocation3], 512  }
  0x16   : > { %633 = vsyncadd (%p515_p9), [#allocation3], 4294966784  ;;  %p287_p13 = scmp.lt.s32.totalorder %s718_s28, 1  ;;  %v295_v0 = vld [vmem:[#allocation2 + $0x18] sm:$0xff]  ;;  %v294_v1 = vld [vmem:[#allocation2 + $0x10] sm:$0xff]  ;;  %vm300_vm0 = vcmask 261120  }
  0x17   : > { %316 = vmatpush.msra.mxu0 %v295_v0  ;;  %v332_v2 = vld [vmem:[%s852_s3 + $0x38] sm:$0xff]  ;;  %v293_v3 = vld [vmem:[#allocation2 + $0x8] sm:$0xff]  ;;  %v331_v4 = vld [vmem:[%s852_s3 + $0x30] sm:$0xff]  ;;  %vm337_vm1 = vcmask 523264   ;;  %s284_s19 = sand.u32 1, %s644_s25   ;;  %vm397_vm2 = vcmask 130048  }
  0x18   : > { %s288_s20 = scalar_select %p287_p13, %s718_s28, 1  ;;  %349 = vmatpush.msra.mxu1 %v332_v2  ;;  %v330_v5 = vld [vmem:[%s852_s3 + $0x28] sm:$0xff]  ;;  %v292_v6 = vld [vmem:[#allocation2] sm:$0xff]  ;;  %v328_v9 = vld [vmem:[%s852_s3 + $0x18] sm:$0xff] }
  0x19   : > { %317 = vmatpush.msra.mxu0 %v294_v1  ;;  %v329_v8 = vld [vmem:[%s852_s3 + $0x20] sm:$0xff]  ;;  %v327_v10 = vld [vmem:[%s852_s3 + $0x10] sm:$0xff]  ;;  %v326_v11 = vld [vmem:[%s852_s3 + $0x8] sm:$0xff]  ;;  %s400_s16 = scalar_lea.sflag [#allocation4], %s284_s19 }
  0x1a   : > { %s493_s21 = sshll.u32 %s288_s20, 3  ;;  %350 = vmatpush.msra.mxu1 %v331_v4  ;;  %v325_v12 = vld [vmem:[%s852_s3] sm:$0xff]  ;;  %v369_v13 = vld [vmem:[%s854_s5 + $0x38] sm:$0xff]  ;;  %v368_v14 = vld [vmem:[%s854_s5 + $0x30] sm:$0xff]  ;;  %s492_s20 = sshll.u32 %s284_s19, 3 }
  0x1b   : > { %s290_s9 = scalar_lea.vmem %s849_s0, %s493_s21  ;;  %318 = vmatpush.msra.mxu0 %v293_v3  ;;  %385 = vmatpush.msra.mxu2 %v369_v13  ;;  %v367_v15 = vld [vmem:[%s854_s5 + $0x28] sm:$0xff]  ;;  %v366_v16 = vld [vmem:[%s854_s5 + $0x20] sm:$0xff]  ;;  %v365_v17 = vld [vmem:[%s854_s5 + $0x18] sm:$0xff]  ;;  %s498_s21 = sshll.u32 %s718_s28, 3 }
  0x1c   : > { %v291_v7 = vld [vmem:[%s290_s9] sm:$0xff]  ;;  %351 = vmatpush.msra.mxu1 %v330_v5  ;;  %v364_v22 = vld [vmem:[%s854_s5 + $0x10] sm:$0xff]  ;;  %v363_v23 = vld [vmem:[%s854_s5 + $0x8] sm:$0xff]  ;;  %s410_s29 = scalar_lea.hbm %s856_s7, %s498_s21  ;;  %s286_s13 = scalar_lea.vmem [#allocation5], %s492_s20 }
  0x1d   : > { %319 = vmatpush.msra.mxu0 %v292_v6  ;;  %386 = vmatpush.msra.mxu2 %v368_v14  ;;  %v553_v18 = vld [vmem:[%s851_s2] ss:$0 sm:$0xff]  ;;  %s412_s14 = sshll.u32 %s286_s13, 4  ;;  %s414_s15 = sshll.u32 %s410_s29, 4  ;;  %s413_s14 = int_to_ptr.vmem [resolvable:$true] %s412_s14  ;;  %s415_s15 = int_to_ptr.hbm [resolvable:$true] %s414_s15 }
  0x1e   : > { %494 = vmatmul.msk.f32.vlgmr.msra.gmra.mxu0 %vm300_vm0, %v291_v7  ;;  %352 = vmatpush.msra.mxu1 %v329_v8  ;;  %v362_v24 = vld [vmem:[%s854_s5] sm:$0xff]  ;;  %s600_s28 = sshra.s32 %s415_s15, 4  ;;  %s606_s20 = scalar_lea.hbm %s856_s7, 16  ;;  %s601_s28 = int_to_ptr.hbm [resolvable:$true] %s600_s28 }
  0x1f   : > { %387 = vmatpush.msra.mxu2 %v367_v15  ;;  %v554_v25 = vld [vmem:[%s853_s4] ss:$0 sm:$0xff]  ;;  %s602_s17 = scalar_lea.hbm %s601_s28, 8  ;;  %p607_p3 = scmp.lt.s32.totalorder %s601_s28, %s856_s7 }
  0x20   : > { %353 = vmatpush.msra.mxu1 %v328_v9  ;;  %v555_v29 = vld [vmem:[%s855_s6] ss:$0 sm:$0xff]  ;;  %p603_p0 = scmp.ne.s32.totalorder %s601_s28, %s602_s17  ;;  %p608_p4 = scmp.lt.s32.totalorder %s606_s20, %s602_s17 }
  0x21   : > { %388 = vmatpush.msra.mxu2 %v366_v16 }
  0x22   : > { %354 = vmatpush.msra.mxu1 %v327_v10  ;;  %p604_p1 = pnand %p603_p0, %p735_p5  ;;  %p609_p7 = por %p608_p4, %p607_p3 }
  0x23   : > { %389 = vmatpush.msra.mxu2 %v365_v17 }
  0x24   : > { %355 = vmatpush.msra.mxu1 %v326_v11  ;;  %p605_p2 = pneg %p604_p1 }
  0x25   : > { %390 = vmatpush.msra.mxu2 %v364_v22 }
  0x26   : > { %356 = vmatpush.msra.mxu1 %v325_v12  ;;  %p610_p8 = pnand %p609_p7, %p605_p2 }
  0x27   : > { %391 = vmatpush.msra.mxu2 %v363_v23 }
  0x29   : > { %392 = vmatpush.msra.mxu2 %v362_v24 }
  0x9b   : > { %v321_v19 = vpop.f32.mrf.mxu0 }
  0x9c   : > { %v322_v20 = vadd.f32 %v553_v18, %v321_v19 }
  0x9e   : > { %v324_v21 = vmax.f32 %v322_v20, 0.0 }
  0xa0   : > { %495 = vmatmul.msk.f32.vlgmr.msra.gmra.mxu1 %vm337_vm1, %v324_v21 }
 0x11d   : > { %v358_v26 = vpop.f32.mrf.mxu1 }
 0x11e   : > { %v359_v27 = vadd.f32 %v554_v25, %v358_v26 }
 0x120   : > { %v361_v28 = vmax.f32 %v359_v27, 0.0 }
 0x122   : > { %496 = vmatmul.msk.f32.vlgmr.msra.gmra.mxu2 %vm337_vm1, %v361_v28 }
 0x1a5   : > { %v394_v30 = vpop.f32.mrf.mxu2 }
 0x1a6   : > { %v395_v31 = vadd.f32 %v555_v29, %v394_v30 }
 0x1a8   : > { %398 = vst.msk [vmem:[%s286_s13] sm:$0xff] %vm397_vm2, %v395_v31 }
 0x1a9   : > { %613 = shalt.err (!%p610_p8)
}
 0x1aa   : > { %505 = dma.vmem_to_hbm [thread:$0]  (%p735_p5), %s413_s14, 128, %s415_s15, %s400_s16  }
 0x1ab PF: > { %p517_p9 = scmp.ge.s32.totalorder %s652_s27, 2  ;;  %s426_s19 = sand.u32 1, %s640_s24  }
 0x1ac   : > { %s427_s29 = scalar_lea.sflag [#allocation4], %s426_s19 }
 0x1ad   : > { %p512_p10 = pnand %p517_p9, %p739_p6 }
 0x1af   : > { %p513_p11 = pneg %p512_p10 }
 0x1b1   : > { %635 = dma.done.wait (%p513_p11), %s427_s29, 128  }
 0x1b2   : > { %637 = vsyncadd (%p513_p11), %s427_s29, 4294967168  ;;  %p18_p12 = scmp.ge.s32.totalorder %s722_s30, 4   ;;  %s859_s24 = smov %s644_s25 }
 0x1b3   : > { %s860_s25 = smov %s648_s26  ;;  %s861_s26 = smov %s733_s10 }
 0x1b4   : > { %s862_s27 = smov %s722_s30  ;;  %20 = sbr.rel (!%p18_p12) target bundleno = 4 (0x4), region = 88 }
 0x1b9   :  { %433 = vsyncpa [#allocation3], 1 }
 0x1ba   :  { %435 = vsyncpa [#allocation3 + $0x1], 1 }
 0x1bb   :  { %436 = vsyncpa [#allocation4], 1 }
 0x1bc   :  { %438 = vsyncpa [#allocation4 + $0x1], 1 }

</bundles_post_ra>
